<compile_context>
chip_gen: v7x
topology: tpu7x:2x2x1
jax: 0.10.0
libtpu: 0.0.40
codegen_flags: <defaults>
</compile_context>

<pallas_src>
import functools

import numpy as np
import jax
import jax.numpy as jnp
from jax.experimental import pallas as pl
from jax.experimental.pallas import tpu as pltpu


def _adaptive_pool_matrix(in_size, out_size):
    """Row i holds the averaging weights of PyTorch AdaptiveAvgPool window i."""
    p = np.zeros((out_size, in_size), dtype=np.float32)
    for i in range(out_size):
        start = (i * in_size) // out_size
        end = -((-(i + 1) * in_size) // out_size)  # ceil
        p[i, start:end] = 1.0 / float(end - start)
    return p


def _hw_budgets():
    """Generation-aware (x-tile budget, baseline vmem limit, physical VMEM cap)."""
    try:
        cap = int(pltpu.get_tpu_info().vmem_capacity_bytes)
    except Exception:                       # no info: assume smallest (v7x-class) VMEM
        cap = 64 * 1024 * 1024
    if cap <= 64 * 1024 * 1024:             # v7x: 64 MiB VMEM per TensorCore
        return 8 * 1024 * 1024, 28 * 1024 * 1024, cap
    return 16 * 1024 * 1024, 72 * 1024 * 1024, cap   # v5e / v6e: 128 MiB VMEM


def _choose_tb(B, per_sample_bytes, tile_budget_bytes, itemsize):
    """Samples per grid step (TB)."""
    sub = 16 if itemsize < 4 else 8         # sublane packing granularity of the x tile
    tb_budget = max(1, tile_budget_bytes // per_sample_bytes)
    if B <= 2 * sub:                        # tiny batch: one full block (always legal)
        return B
    tb = min(tb_budget, B // 2)             # >= 2 grid steps -> both v7x TCs stay busy
    if tb >= 128:
        tb = (tb // 128) * 128              # big, aligned DMAs
    else:
        tb = max(sub, (tb // sub) * sub)
    return tb


def _route_kernel(x_ref, pw_ref, w1_ref, w2_ref, w3_ref, o_ref, *, tb, c,
                  per_channel_pool):
    x = x_ref[...]

    # Both adaptive average pools as a single MXU matmul.
    pooled = jnp.dot(x, pw_ref[...], preferred_element_type=jnp.float32)
    if per_channel_pool:
        # x block was (tb*c, HW): regroup per-channel pooled stats per sample.
        pooled = pooled.reshape(tb, c * 10)
    # else: x block was (tb, c*HW); block-diag pooling already yields (tb, c*10).

    # concat([a1.expand, a3]) + 1x1 conv folded into one matmul; ReLU.
    h1 = jnp.maximum(
        jnp.dot(pooled, w1_ref[...], preferred_element_type=jnp.float32), 0.0)
    # Depthwise 3x3 conv (valid padding on the 3x3 map) as a block-diag matmul; ReLU.
    h2 = jnp.maximum(
        jnp.dot(h1, w2_ref[...], preferred_element_type=jnp.float32), 0.0)
    # Final 1x1 conv + sigmoid.  One (tb, O) store per grid step.
    o_ref[...] = jax.nn.sigmoid(
        jnp.dot(h2, w3_ref[...], preferred_element_type=jnp.float32))


def route_func_pallas(x, w1, w2, w3):
    B, C, H, W = x.shape
    HW = H * W
    S = w1.shape[0]
    O = w3.shape[0]

    # Keep x's dtype (bf16 stays bf16 -> half the HBM traffic; no wrapper cast,
    # which would be its own full HBM pass).  Accumulation is always f32.
    compute_dtype = jnp.bfloat16 if x.dtype == jnp.dtype(jnp.bfloat16) else jnp.float32
    itemsize = np.dtype(compute_dtype).itemsize

    # Per-channel pooling matrix (HW, 10): col 0 = global avg, cols 1..9 = 3x3 windows.
    p1 = np.full((1, HW), 1.0 / HW, dtype=np.float32)
    p3 = np.kron(_adaptive_pool_matrix(H, 3), _adaptive_pool_matrix(W, 3))   # (9, HW)
    pool_np = np.concatenate([p1, p3], axis=0).T                             # (HW, 10)

    # Block-diagonal (over channels) pooling keeps the per-step chain relayout-free;
    # fall back to per-channel pooling + in-kernel regroup when C is large enough
    # that the (C*HW, C*10) matrix would waste FLOPs / VMEM.
    blockdiag_bytes = C * HW * C * 10 * itemsize
    per_channel_pool = (C > 8) or (blockdiag_bytes > 4 * 1024 * 1024)
    if per_channel_pool:
        x2 = x.reshape(B * C, HW)
        pw = jnp.asarray(pool_np, dtype=compute_dtype)                       # (HW, 10)
    else:
        x2 = x.reshape(B, C * HW)
        pw = jnp.asarray(np.kron(np.eye(C, dtype=np.float32), pool_np),
                         dtype=compute_dtype)                                # (C*HW, C*10)
    if x2.dtype != jnp.dtype(compute_dtype):
        x2 = x2.astype(compute_dtype)

    # Fused post-pooling weights (tiny, f32, VMEM-resident across the grid).
    w1m = w1.reshape(S, 2 * C).astype(jnp.float32)
    w1a = w1m[:, :C].T                      # (C, S) -> multiplies a1 (broadcast over 9)
    w1b = w1m[:, C:].T                      # (C, S) -> multiplies a3
    eye9 = jnp.eye(9, dtype=jnp.float32)
    col0 = jnp.broadcast_to(w1a[:, None, :, None], (C, 1, S, 9))
    cols9 = w1b[:, None, :, None] * eye9[None, :, None, :]                   # (C, 9, S, 9)
    w1eff = jnp.concatenate([col0, cols9], axis=1).reshape(C * 10, S * 9)    # (C*10, S*9)

    w2m = w2.reshape(S, 9).astype(jnp.float32)
    w2eff = (w2m[:, :, None] * jnp.eye(S, dtype=jnp.float32)[:, None, :]
             ).reshape(S * 9, S)                                             # (S*9, S)
    w3t = w3.reshape(O, S).astype(jnp.float32).T                             # (S, O)

    # Generation-aware tile sizing.
    tile_budget, vmem_base, vmem_cap = _hw_budgets()
    per_sample = C * HW * itemsize
    TB = _choose_tb(B, per_sample, tile_budget, itemsize)
    grid = (pl.cdiv(B, TB),)   # no jnp.pad: boundary block handled by Pallas masking

    w_bytes = int(pw.size) * itemsize + (int(w1eff.size) + int(w2eff.size)
                                         + int(w3t.size)) * 4
    needed = 2 * TB * per_sample + 2 * TB * O * 4 + 2 * w_bytes + (4 << 20)
    vmem_limit = int(min(int(0.9 * vmem_cap), max(vmem_base, needed)))

    if per_channel_pool:
        x_spec = pl.BlockSpec((TB * C, HW), lambda b: (b, 0))
        pool_flops = 2 * B * C * HW * 10
    else:
        x_spec = pl.BlockSpec((TB, C * HW), lambda b: (b, 0))
        pool_flops = 2 * B * (C * HW) * (C * 10)
    flops = (pool_flops + 2 * B * (C * 10) * (S * 9)
             + 2 * B * (S * 9) * S + 2 * B * S * O)
    bytes_accessed = int(x2.size) * itemsize + w_bytes + B * O * 4

    out = pl.pallas_call(
        functools.partial(_route_kernel, tb=TB, c=C,
                          per_channel_pool=per_channel_pool),
        out_shape=jax.ShapeDtypeStruct((B, O), jnp.float32),
        grid=grid,
        in_specs=[
            x_spec,
            pl.BlockSpec(tuple(pw.shape), lambda b: (0, 0)),
            pl.BlockSpec((C * 10, S * 9), lambda b: (0, 0)),
            pl.BlockSpec((S * 9, S), lambda b: (0, 0)),
            pl.BlockSpec((S, O), lambda b: (0, 0)),
        ],
        out_specs=pl.BlockSpec((TB, O), lambda b: (b, 0)),
        compiler_params=pltpu.CompilerParams(
            dimension_semantics=("parallel",),     # megacore-shards batch on v7x
            vmem_limit_bytes=vmem_limit),
        cost_estimate=pl.CostEstimate(
            flops=int(flops), transcendentals=int(B * O),
            bytes_accessed=int(bytes_accessed)),
    )(x2, pw, w1eff, w2eff, w3t)

    # TODO(synk): output store is (TB, O) with O=12 lanes (lane-sparse); a transposed
    # (O, TB) store would be lane-dense, but the whole output is only B*O*4 bytes so
    # the win is negligible and the plain store is the most robust lowering.
    return out.reshape(B, O, 1, 1)   # PyTorch shape (B, num_experts*out_channels, 1, 1)


def route_func_reference(x, w1, w2, w3):
    """Pure-JAX reference mirroring the PyTorch forward (for verification)."""
    B, C, H, W = x.shape
    S = w1.shape[0]
    O = w3.shape[0]
    a1 = jnp.mean(x, axis=(2, 3), keepdims=True)                   # (B,C,1,1)
    rows = []
    for i in range(3):
        hs, he = (i * H) // 3, -((-(i + 1) * H) // 3)
        cols = []
        for j in range(3):
            ws, we = (j * W) // 3, -((-(j + 1) * W) // 3)
            cols.append(jnp.mean(x[:, :, hs:he, ws:we], axis=(2, 3)))
        rows.append(jnp.stack(cols, axis=-1))
    a3 = jnp.stack(rows, axis=-2)                                  # (B,C,3,3)
    att = jnp.concatenate([jnp.broadcast_to(a1, a3.shape), a3], axis=1)
    h1 = jax.nn.relu(jnp.einsum('sc,bcij->bsij', w1.reshape(S, 2 * C), att))
    h2 = jax.nn.relu(jnp.einsum('sij,bsij->bs', w2.reshape(S, 3, 3), h1))
    out = jax.nn.sigmoid(jnp.einsum('os,bs->bo', w3.reshape(O, S), h2))
    return out.reshape(B, O, 1, 1)


if __name__ == "__main__":
    # route_func(in_channels=4, out_channels=4, num_experts=3, reduction=16, mode='out')
    B, C, H, W = 2, 4, 16, 16
    num_experts, reduction, out_channels = 3, 16, 4
    S = max(C // reduction, reduction)           # squeeze_channels = 16
    O = num_experts * out_channels               # mode='out' -> 12

    key = jax.random.PRNGKey(0)
    kx, k1, k2, k3 = jax.random.split(key, 4)
    x = jax.random.normal(kx, (B, C, H, W), dtype=jnp.float32)
    # conv weight shapes from the module __init__ (bias=False everywhere)
    w1 = 0.2 * jax.random.normal(k1, (S, 2 * C, 1, 1), dtype=jnp.float32)  # 1x1 conv
    w2 = 0.2 * jax.random.normal(k2, (S, 1, 3, 3), dtype=jnp.float32)      # depthwise 3x3
    w3 = 0.2 * jax.random.normal(k3, (O, S, 1, 1), dtype=jnp.float32)      # 1x1 conv

    out = jax.block_until_ready(route_func_pallas(x, w1, w2, w3))
    ref = route_func_reference(x, w1, w2, w3)
    np.testing.assert_allclose(np.asarray(out), np.asarray(ref),
                               rtol=2e-2, atol=2e-2)

    # Larger batch: exercises the multi-step grid (>=2 steps, v7x megacore) and the
    # unpadded boundary block (200 % TB != 0) without any jnp.pad of x.
    B2 = 200
    x_big = jax.random.normal(jax.random.PRNGKey(1), (B2, C, H, W),
                              dtype=jnp.float32)
    out_big = jax.block_until_ready(route_func_pallas(x_big, w1, w2, w3))
    ref_big = route_func_reference(x_big, w1, w2, w3)
    np.testing.assert_allclose(np.asarray(out_big), np.asarray(ref_big),
                               rtol=2e-2, atol=2e-2)

    print("KERNEL_OK")
</pallas_src>

<mosaic_0001>
module attributes {stable_mosaic.version = 11 : i64} {
  func.func @_route_kernel(%arg0: i32, %arg1: memref<2x1024xf32, #tpu.memory_space<vmem>>, %arg2: memref<1024x40xf32, #tpu.memory_space<vmem>>, %arg3: memref<40x144xf32, #tpu.memory_space<vmem>>, %arg4: memref<144x16xf32, #tpu.memory_space<vmem>>, %arg5: memref<16x12xf32, #tpu.memory_space<vmem>>, %arg6: memref<2x12xf32, #tpu.memory_space<vmem>>) attributes {dimension_semantics = [#tpu.dimension_semantics<parallel>], iteration_bounds = array<i64: 1>, scalar_prefetch = 0 : i64, scratch_operands = 0 : i64, tpu.core_type = #tpu.core_type<tc>, window_params = [{transform_indices = @transform_0, window_bounds = array<i64: 2, 1024>}, {pipeline_mode = #tpu.pipeline_mode<synchronous>, transform_indices = @transform_1, window_bounds = array<i64: 1024, 40>}, {pipeline_mode = #tpu.pipeline_mode<synchronous>, transform_indices = @transform_2, window_bounds = array<i64: 40, 144>}, {pipeline_mode = #tpu.pipeline_mode<synchronous>, transform_indices = @transform_3, window_bounds = array<i64: 144, 16>}, {pipeline_mode = #tpu.pipeline_mode<synchronous>, transform_indices = @transform_4, window_bounds = array<i64: 16, 12>}, {transform_indices = @transform_5, window_bounds = array<i64: 2, 12>}]} {
    %c0 = arith.constant 0 : index
    %c0_0 = arith.constant 0 : index
    %0 = vector.load %arg1[%c0, %c0_0] : memref<2x1024xf32, #tpu.memory_space<vmem>>, vector<2x1024xf32>
    %c0_1 = arith.constant 0 : index
    %c0_2 = arith.constant 0 : index
    %1 = vector.load %arg2[%c0_1, %c0_2] : memref<1024x40xf32, #tpu.memory_space<vmem>>, vector<1024x40xf32>
    %cst = arith.constant dense<0.000000e+00> : vector<2x40xf32>
    %2 = tpu.matmul %0, %1, %cst {dimension_numbers = #tpu.dot_dimension_numbers<[1], [0], [0], [1], [0, 0, 1, 1], [], []>} : vector<2x1024xf32>, vector<1024x40xf32>, vector<2x40xf32> -> vector<2x40xf32>
    %c0_3 = arith.constant 0 : index
    %c0_4 = arith.constant 0 : index
    %3 = vector.load %arg3[%c0_3, %c0_4] : memref<40x144xf32, #tpu.memory_space<vmem>>, vector<40x144xf32>
    %cst_5 = arith.constant dense<0.000000e+00> : vector<2x144xf32>
    %4 = tpu.matmul %2, %3, %cst_5 {dimension_numbers = #tpu.dot_dimension_numbers<[1], [0], [0], [1], [0, 0, 1, 1], [], []>} : vector<2x40xf32>, vector<40x144xf32>, vector<2x144xf32> -> vector<2x144xf32>
    %cst_6 = arith.constant 0.000000e+00 : f32
    %5 = vector.broadcast %cst_6 : f32 to vector<2x144xf32>
    %6 = arith.maximumf %4, %5 : vector<2x144xf32>
    %c0_7 = arith.constant 0 : index
    %c0_8 = arith.constant 0 : index
    %7 = vector.load %arg4[%c0_7, %c0_8] : memref<144x16xf32, #tpu.memory_space<vmem>>, vector<144x16xf32>
    %cst_9 = arith.constant dense<0.000000e+00> : vector<2x16xf32>
    %8 = tpu.matmul %6, %7, %cst_9 {dimension_numbers = #tpu.dot_dimension_numbers<[1], [0], [0], [1], [0, 0, 1, 1], [], []>} : vector<2x144xf32>, vector<144x16xf32>, vector<2x16xf32> -> vector<2x16xf32>
    %cst_10 = arith.constant 0.000000e+00 : f32
    %9 = vector.broadcast %cst_10 : f32 to vector<2x16xf32>
    %10 = arith.maximumf %8, %9 : vector<2x16xf32>
    %c0_11 = arith.constant 0 : index
    %c0_12 = arith.constant 0 : index
    %11 = vector.load %arg5[%c0_11, %c0_12] : memref<16x12xf32, #tpu.memory_space<vmem>>, vector<16x12xf32>
    %cst_13 = arith.constant dense<0.000000e+00> : vector<2x12xf32>
    %12 = tpu.matmul %10, %11, %cst_13 {dimension_numbers = #tpu.dot_dimension_numbers<[1], [0], [0], [1], [0, 0, 1, 1], [], []>} : vector<2x16xf32>, vector<16x12xf32>, vector<2x12xf32> -> vector<2x12xf32>
    %13 = arith.negf %12 : vector<2x12xf32>
    %14 = math.exp %13 : vector<2x12xf32>
    %cst_14 = arith.constant 1.000000e+00 : f32
    %15 = vector.broadcast %cst_14 : f32 to vector<2x12xf32>
    %16 = arith.addf %15, %14 : vector<2x12xf32>
    %17 = arith.divf %15, %16 : vector<2x12xf32>
    %c0_15 = arith.constant 0 : index
    %c0_16 = arith.constant 0 : index
    %18 = vector.load %arg6[%c0_15, %c0_16] : memref<2x12xf32, #tpu.memory_space<vmem>>, vector<2x12xf32>
    tpu.vector_store %arg6[%c0_15, %c0_16], %17 {strides = array<i32>} : memref<2x12xf32, #tpu.memory_space<vmem>>, vector<2x12xf32>,
    return
  }
  func.func @transform_0(%arg0: i32) -> (i32, i32) {
    %c0_i32 = arith.constant 0 : i32
    %c0_i32_0 = arith.constant 0 : i32
    return %arg0, %c0_i32 : i32, i32
  }
  func.func @transform_1(%arg0: i32) -> (i32, i32) {
    %c0_i32 = arith.constant 0 : i32
    %c0_i32_0 = arith.constant 0 : i32
    %c0_i32_1 = arith.constant 0 : i32
    return %c0_i32, %c0_i32_0 : i32, i32
  }
  func.func @transform_2(%arg0: i32) -> (i32, i32) {
    %c0_i32 = arith.constant 0 : i32
    %c0_i32_0 = arith.constant 0 : i32
    %c0_i32_1 = arith.constant 0 : i32
    return %c0_i32, %c0_i32_0 : i32, i32
  }
  func.func @transform_3(%arg0: i32) -> (i32, i32) {
    %c0_i32 = arith.constant 0 : i32
    %c0_i32_0 = arith.constant 0 : i32
    %c0_i32_1 = arith.constant 0 : i32
    return %c0_i32, %c0_i32_0 : i32, i32
  }
  func.func @transform_4(%arg0: i32) -> (i32, i32) {
    %c0_i32 = arith.constant 0 : i32
    %c0_i32_0 = arith.constant 0 : i32
    %c0_i32_1 = arith.constant 0 : i32
    return %c0_i32, %c0_i32_0 : i32, i32
  }
  func.func @transform_5(%arg0: i32) -> (i32, i32) {
    %c0_i32 = arith.constant 0 : i32
    %c0_i32_0 = arith.constant 0 : i32
    return %arg0, %c0_i32 : i32, i32
  }
}

</mosaic_0001>

<bundles_post_ra>
// kernel: tpu_custom_call.1
= control target key start
LH: loop header
LB: loop body
LE: loop exit
PB: predicated region body
PF: predicated region fallthrough
CT: control target
= control target key end

     0   :  { %v1107_v47 = vmov 1983009808   ;;  %v157_v49 = vlaneseq  ;;  %s1647_s0 = inlined_call_operand.vmem [shape: f32[2,1024], index: 0, kind: input, shape index: {}]   ;;  %s1648_s1 = inlined_call_operand.vmem [shape: f32[1024,40], index: 1, kind: input, shape index: {}]   ;;  %s1649_s2 = inlined_call_operand.vmem [shape: f32[40,144], index: 2, kind: input, shape index: {}]   ;;  %s1650_s3 = inlined_call_operand.vmem [shape: f32[144,16], index: 3, kind: input, shape index: {}]   ;;  %s1651_s4 = inlined_call_operand.vmem [shape: f32[16,12], index: 4, kind: input, shape index: {}]   ;;  %s1652_s5 = inlined_call_operand.hbm [shape: f32[2,12], index: 5, kind: output, shape index: {}]  }
   0x1   :  { %v39_v0 = vld [vmem:[%s1648_s1 + $0x80] sm:$0xff]  ;;  %v40_v1 = vld [vmem:[%s1648_s1 + $0x88] sm:$0xff]  ;;  %v41_v11 = vld [vmem:[%s1648_s1 + $0x90] sm:$0xff]  ;;  %v155_v48 = vunpack.c.l.s4 %v1107_v47 }
   0x2   :  { %v71_v2 = vld [vmem:[%s1648_s1 + $0x180] sm:$0xff]  ;;  %v906_v3 = vpack.c.bf16 %v40_v1, %v39_v0  ;;  %v72_v4 = vld [vmem:[%s1648_s1 + $0x188] sm:$0xff]  ;;  %v42_v13 = vld [vmem:[%s1648_s1 + $0x98] sm:$0xff]  ;;  %v158_v0 = vshrl.u32 %v157_v49, 7 }
   0x3   :  { %v23_v5 = vld [vmem:[%s1648_s1] sm:$0xff]  ;;  %v24_v6 = vld [vmem:[%s1648_s1 + $0x8] sm:$0xff]  ;;  %v938_v7 = vpack.c.bf16 %v72_v4, %v71_v2  ;;  %v73_v14 = vld [vmem:[%s1648_s1 + $0x190] sm:$0xff]  ;;  %v910_v16 = vpack.c.bf16 %v42_v13, %v41_v11  ;;  %v156_v63 = vunpack.c.0.s8 %v155_v48 }
   0x4   :  { %v908_v8 = vpack.c.bf16 %v24_v6, %v23_v5  ;;  %v55_v9 = vld [vmem:[%s1648_s1 + $0x100] sm:$0xff]  ;;  %v56_v10 = vld [vmem:[%s1648_s1 + $0x108] sm:$0xff]  ;;  %907 = vmatprep.subr.bf16.mxu0 %v906_v3  ;;  %v74_v15 = vld [vmem:[%s1648_s1 + $0x198] sm:$0xff] }
   0x5   :  { %v940_v12 = vpack.c.bf16 %v56_v10, %v55_v9  ;;  %939 = vmatprep.subr.bf16.mxu1 %v938_v7  ;;  %v942_v17 = vpack.c.bf16 %v74_v15, %v73_v14  ;;  %v25_v18 = vld [vmem:[%s1648_s1 + $0x10] sm:$0xff]  ;;  %v26_v19 = vld [vmem:[%s1648_s1 + $0x18] sm:$0xff]  ;;  %v43_v23 = vld [vmem:[%s1648_s1 + $0xa0] sm:$0xff]  ;;  %v1292_v13 = vsub.s32 %v156_v63, %v158_v0 }
   0x6   :  { %909 = vmatpush3.bf16.msra.mxu0 %v908_v8  ;;  %v57_v20 = vld [vmem:[%s1648_s1 + $0x110] sm:$0xff]  ;;  %v912_v21 = vpack.c.bf16 %v26_v19, %v25_v18  ;;  %v58_v22 = vld [vmem:[%s1648_s1 + $0x118] sm:$0xff]  ;;  %v44_v24 = vld [vmem:[%s1648_s1 + $0xa8] sm:$0xff] }
   0x7   :  { %941 = vmatpush3.bf16.msra.mxu1 %v940_v12  ;;  %911 = vmatprep.subr.bf16.mxu0 %v910_v16  ;;  %v944_v25 = vpack.c.bf16 %v58_v22, %v57_v20  ;;  %v914_v26 = vpack.c.bf16 %v44_v24, %v43_v23  ;;  %v75_v27 = vld [vmem:[%s1648_s1 + $0x1a0] sm:$0xff]  ;;  %v76_v28 = vld [vmem:[%s1648_s1 + $0x1a8] sm:$0xff]  ;;  %v45_v35 = vld [vmem:[%s1648_s1 + $0xb0] sm:$0xff] }
   0x8   :  { %943 = vmatprep.subr.bf16.mxu1 %v942_v17  ;;  %v27_v29 = vld [vmem:[%s1648_s1 + $0x20] sm:$0xff]  ;;  %v946_v30 = vpack.c.bf16 %v76_v28, %v75_v27  ;;  %v28_v31 = vld [vmem:[%s1648_s1 + $0x28] sm:$0xff]  ;;  %v46_v36 = vld [vmem:[%s1648_s1 + $0xb8] sm:$0xff] }
   0x9   :  { %v59_v32 = vld [vmem:[%s1648_s1 + $0x120] sm:$0xff]  ;;  %v60_v33 = vld [vmem:[%s1648_s1 + $0x128] sm:$0xff]  ;;  %v916_v34 = vpack.c.bf16 %v28_v31, %v27_v29  ;;  %v77_v37 = vld [vmem:[%s1648_s1 + $0x1b0] sm:$0xff]  ;;  %v918_v39 = vpack.c.bf16 %v46_v36, %v45_v35 }
   0xa   :  { %913 = vmatpush3.bf16.msra.mxu0 %v912_v21  ;;  %v948_v38 = vpack.c.bf16 %v60_v33, %v59_v32  ;;  %v78_v40 = vld [vmem:[%s1648_s1 + $0x1b8] sm:$0xff]  ;;  %v29_v41 = vld [vmem:[%s1648_s1 + $0x30] sm:$0xff]  ;;  %v47_v46 = vld [vmem:[%s1648_s1 + $0xc0] sm:$0xff] }
   0xb   :  { %945 = vmatpush3.bf16.msra.mxu1 %v944_v25  ;;  %915 = vmatprep.subr.bf16.mxu0 %v914_v26  ;;  %v30_v42 = vld [vmem:[%s1648_s1 + $0x38] sm:$0xff]  ;;  %v950_v43 = vpack.c.bf16 %v78_v40, %v77_v37  ;;  %v61_v44 = vld [vmem:[%s1648_s1 + $0x130] sm:$0xff]  ;;  %v48_v50 = vld [vmem:[%s1648_s1 + $0xc8] sm:$0xff] }
   0xc   :  { %947 = vmatprep.subr.bf16.mxu1 %v946_v30  ;;  %v62_v45 = vld [vmem:[%s1648_s1 + $0x138] sm:$0xff]  ;;  %v79_v51 = vld [vmem:[%s1648_s1 + $0x1c0] sm:$0xff]  ;;  %v80_v52 = vld [vmem:[%s1648_s1 + $0x1c8] sm:$0xff]  ;;  %v920_v53 = vpack.c.bf16 %v30_v42, %v29_v41  ;;  %v922_v55 = vpack.c.bf16 %v48_v50, %v47_v46 }
   0xd   :  { %v952_v54 = vpack.c.bf16 %v62_v45, %v61_v44  ;;  %v31_v56 = vld [vmem:[%s1648_s1 + $0x40] sm:$0xff]  ;;  %v32_v57 = vld [vmem:[%s1648_s1 + $0x48] sm:$0xff]  ;;  %v954_v59 = vpack.c.bf16 %v80_v52, %v79_v51  ;;  %v49_v61 = vld [vmem:[%s1648_s1 + $0xd0] sm:$0xff] }
   0xe   :  { %917 = vmatpush3.bf16.msra.mxu0 %v916_v34  ;;  %v63_v58 = vld [vmem:[%s1648_s1 + $0x140] sm:$0xff]  ;;  %v64_v60 = vld [vmem:[%s1648_s1 + $0x148] sm:$0xff]  ;;  %v50_v62 = vld [vmem:[%s1648_s1 + $0xd8] sm:$0xff]  ;;  %v924_v3 = vpack.c.bf16 %v32_v57, %v31_v56 }
   0xf   :  { %949 = vmatpush3.bf16.msra.mxu1 %v948_v38  ;;  %919 = vmatprep.subr.bf16.mxu0 %v918_v39  ;;  %v81_v1 = vld [vmem:[%s1648_s1 + $0x1d0] sm:$0xff]  ;;  %v82_v2 = vld [vmem:[%s1648_s1 + $0x1d8] sm:$0xff]  ;;  %v956_v4 = vpack.c.bf16 %v64_v60, %v63_v58  ;;  %v926_v5 = vpack.c.bf16 %v50_v62, %v49_v61  ;;  %v51_v11 = vld [vmem:[%s1648_s1 + $0xe0] sm:$0xff] }
  0x10   :  { %951 = vmatprep.subr.bf16.mxu1 %v950_v43  ;;  %v33_v6 = vld [vmem:[%s1648_s1 + $0x50] sm:$0xff]  ;;  %v34_v7 = vld [vmem:[%s1648_s1 + $0x58] sm:$0xff]  ;;  %v958_v9 = vpack.c.bf16 %v82_v2, %v81_v1  ;;  %v52_v12 = vld [vmem:[%s1648_s1 + $0xe8] sm:$0xff] }
  0x11   :  { %v65_v8 = vld [vmem:[%s1648_s1 + $0x150] sm:$0xff]  ;;  %v66_v10 = vld [vmem:[%s1648_s1 + $0x158] sm:$0xff]  ;;  %v83_v14 = vld [vmem:[%s1648_s1 + $0x1e0] sm:$0xff]  ;;  %v928_v16 = vpack.c.bf16 %v34_v7, %v33_v6  ;;  %v930_v19 = vpack.c.bf16 %v52_v12, %v51_v11 }
  0x12   :  { %921 = vmatpush3.bf16.msra.mxu0 %v920_v53  ;;  %v84_v15 = vld [vmem:[%s1648_s1 + $0x1e8] sm:$0xff]  ;;  %v35_v17 = vld [vmem:[%s1648_s1 + $0x60] sm:$0xff]  ;;  %v960_v18 = vpack.c.bf16 %v66_v10, %v65_v8  ;;  %v53_v25 = vld [vmem:[%s1648_s1 + $0xf0] sm:$0xff] }
  0x13   :  { %953 = vmatpush3.bf16.msra.mxu1 %v952_v54  ;;  %923 = vmatprep.subr.bf16.mxu0 %v922_v55  ;;  %v36_v20 = vld [vmem:[%s1648_s1 + $0x68] sm:$0xff]  ;;  %v67_v21 = vld [vmem:[%s1648_s1 + $0x160] sm:$0xff]  ;;  %v962_v23 = vpack.c.bf16 %v84_v15, %v83_v14  ;;  %v54_v26 = vld [vmem:[%s1648_s1 + $0xf8] sm:$0xff] }
  0x14   :  { %955 = vmatprep.subr.bf16.mxu1 %v954_v59  ;;  %v21_v22 = vld [vmem:[%s1647_s0] sm:$0xff]  ;;  %v68_v24 = vld [vmem:[%s1648_s1 + $0x168] sm:$0xff]  ;;  %v85_v29 = vld [vmem:[%s1648_s1 + $0x1f0] sm:$0xff]  ;;  %v932_v31 = vpack.c.bf16 %v36_v20, %v35_v17  ;;  %v934_v35 = vpack.c.bf16 %v54_v26, %v53_v25 }
  0x15   :  { %v160_v27 = vrot.slane %v21_v22, %v1292_v13  ;;  %v153_v28 = vcombine.high %v21_v22, %v21_v22  ;;  %v86_v30 = vld [vmem:[%s1648_s1 + $0x1f8] sm:$0xff]  ;;  %v964_v34 = vpack.c.bf16 %v68_v24, %v67_v21  ;;  %v37_v36 = vld [vmem:[%s1648_s1 + $0x70] sm:$0xff]  ;;  %v103_v42 = vld [vmem:[%s1648_s1 + $0x280] sm:$0xff] }
  0x16   :  { %925 = vmatpush3.bf16.msra.mxu0 %v924_v3  ;;  %v38_v37 = vld [vmem:[%s1648_s1 + $0x78] sm:$0xff]  ;;  %v69_v38 = vld [vmem:[%s1648_s1 + $0x170] sm:$0xff]  ;;  %v966_v39 = vpack.c.bf16 %v86_v30, %v85_v29  ;;  %v104_v43 = vld [vmem:[%s1648_s1 + $0x288] sm:$0xff] }
  0x17   :  { %957 = vmatpush3.bf16.msra.mxu1 %v956_v4  ;;  %927 = vmatprep.subr.bf16.mxu0 %v926_v5  ;;  %v168_v32 = vcombine.high %v160_v27, %v160_v27  ;;  %v167_v33 = vrot.slane %v153_v28, %v1292_v13  ;;  %v70_v40 = vld [vmem:[%s1648_s1 + $0x178] sm:$0xff]  ;;  %v135_v44 = vld [vmem:[%s1648_s1 + $0x380] sm:$0xff]  ;;  %v136_v45 = vld [vmem:[%s1648_s1 + $0x388] sm:$0xff]  ;;  %v936_v46 = vpack.c.bf16 %v38_v37, %v37_v36 }
  0x18   :  { %959 = vmatprep.subr.bf16.mxu1 %v958_v9  ;;  %v968_v47 = vpack.c.bf16 %v70_v40, %v69_v38  ;;  %v970_v48 = vpack.c.bf16 %v104_v43, %v103_v42  ;;  %v87_v49 = vld [vmem:[%s1648_s1 + $0x200] sm:$0xff]  ;;  %v88_v50 = vld [vmem:[%s1648_s1 + $0x208] sm:$0xff]  ;;  %v1002_v52 = vpack.c.bf16 %v136_v45, %v135_v44  ;;  %v105_v54 = vld [vmem:[%s1648_s1 + $0x290] sm:$0xff] }
  0x19   :  { %259 = vmatprep.mubr.f32.mxu0 %v168_v32  ;;  %v169_v41 = vcombine.high %v167_v33, %v167_v33  ;;  %v119_v51 = vld [vmem:[%s1648_s1 + $0x300] sm:$0xff]  ;;  %v120_v53 = vld [vmem:[%s1648_s1 + $0x308] sm:$0xff]  ;;  %v106_v55 = vld [vmem:[%s1648_s1 + $0x298] sm:$0xff]  ;;  %v972_v58 = vpack.c.bf16 %v88_v50, %v87_v49 }
  0x1a   :  { %929 = vmatpush3.bf16.msra.mxu0 %v928_v16  ;;  %v137_v56 = vld [vmem:[%s1648_s1 + $0x390] sm:$0xff]  ;;  %v138_v57 = vld [vmem:[%s1648_s1 + $0x398] sm:$0xff]  ;;  %v1004_v59 = vpack.c.bf16 %v120_v53, %v119_v51  ;;  %v974_v60 = vpack.c.bf16 %v106_v55, %v105_v54  ;;  %v107_v2 = vld [vmem:[%s1648_s1 + $0x2a0] sm:$0xff] }
  0x1b   :  { %961 = vmatpush3.bf16.msra.mxu1 %v960_v18  ;;  %931 = vmatprep.subr.bf16.mxu0 %v930_v19  ;;  %v89_v61 = vld [vmem:[%s1648_s1 + $0x210] sm:$0xff]  ;;  %v90_v62 = vld [vmem:[%s1648_s1 + $0x218] sm:$0xff]  ;;  %v1006_v0 = vpack.c.bf16 %v138_v57, %v137_v56  ;;  %v108_v3 = vld [vmem:[%s1648_s1 + $0x2a8] sm:$0xff] }
  0x1c   :  { %963 = vmatprep.subr.bf16.mxu1 %v962_v23  ;;  %329 = vmatprep.mubr.f32.mxu1 %v169_v41  ;;  %v121_v63 = vld [vmem:[%s1648_s1 + $0x310] sm:$0xff]  ;;  %v122_v1 = vld [vmem:[%s1648_s1 + $0x318] sm:$0xff]  ;;  %v139_v4 = vld [vmem:[%s1648_s1 + $0x3a0] sm:$0xff]  ;;  %v976_v6 = vpack.c.bf16 %v90_v62, %v89_v61  ;;  %v978_v8 = vpack.c.bf16 %v108_v3, %v107_v2 }
  0x1d   :  { %v140_v5 = vld [vmem:[%s1648_s1 + $0x3a8] sm:$0xff]  ;;  %v1008_v7 = vpack.c.bf16 %v122_v1, %v121_v63  ;;  %v91_v9 = vld [vmem:[%s1648_s1 + $0x220] sm:$0xff]  ;;  %v109_v15 = vld [vmem:[%s1648_s1 + $0x2b0] sm:$0xff] }
  0x1e   :  { %933 = vmatpush3.bf16.msra.mxu0 %v932_v31  ;;  %v92_v10 = vld [vmem:[%s1648_s1 + $0x228] sm:$0xff]  ;;  %v123_v11 = vld [vmem:[%s1648_s1 + $0x320] sm:$0xff]  ;;  %v1010_v12 = vpack.c.bf16 %v140_v5, %v139_v4  ;;  %v110_v16 = vld [vmem:[%s1648_s1 + $0x2b8] sm:$0xff] }
  0x1f   :  { %965 = vmatpush3.bf16.msra.mxu1 %v964_v34  ;;  %935 = vmatprep.subr.bf16.mxu0 %v934_v35  ;;  %v124_v14 = vld [vmem:[%s1648_s1 + $0x328] sm:$0xff]  ;;  %v141_v17 = vld [vmem:[%s1648_s1 + $0x3b0] sm:$0xff]  ;;  %v142_v18 = vld [vmem:[%s1648_s1 + $0x3b8] sm:$0xff]  ;;  %v980_v19 = vpack.c.bf16 %v92_v10, %v91_v9  ;;  %v982_v22 = vpack.c.bf16 %v110_v16, %v109_v15 }
  0x20   :  { %967 = vmatprep.subr.bf16.mxu1 %v966_v39  ;;  %v93_v20 = vld [vmem:[%s1648_s1 + $0x230] sm:$0xff]  ;;  %v1012_v21 = vpack.c.bf16 %v124_v14, %v123_v11  ;;  %v94_v23 = vld [vmem:[%s1648_s1 + $0x238] sm:$0xff]  ;;  %v1014_v26 = vpack.c.bf16 %v142_v18, %v141_v17  ;;  %v112_v28 = vld [vmem:[%s1648_s1 + $0x2c8] sm:$0xff] }
  0x21   :  { %v125_v24 = vld [vmem:[%s1648_s1 + $0x330] sm:$0xff]  ;;  %v126_v25 = vld [vmem:[%s1648_s1 + $0x338] sm:$0xff]  ;;  %v143_v29 = vld [vmem:[%s1648_s1 + $0x3c0] sm:$0xff] }
  0x22   :  { %937 = vmatpush3.bf16.msra.mxu0 %v936_v46  ;;  %v144_v30 = vld [vmem:[%s1648_s1 + $0x3c8] sm:$0xff] }
  0x23   :  { %969 = vmatpush3.bf16.msra.mxu1 %v968_v47  ;;  %971 = vmatprep.subr.bf16.mxu0 %v970_v48  ;;  %v22_v31 = vld [vmem:[%s1647_s0 + $0x8] sm:$0xff] }
  0x24   :  { %1003 = vmatprep.subr.bf16.mxu1 %v1002_v52 }
  0x25   :  { %260 = vmatmul.mubr.f32.vlgmr.msra.gmra.mrb[0].mxu0 %v160_v27  ;;  %v111_v27 = vld [vmem:[%s1648_s1 + $0x2c0] sm:$0xff] }
  0x26   :  { %330 = vmatmul.mubr.f32.vlgmr.msra.gmra.mrb[0].mxu1 %v167_v33  ;;  %973 = vmatpush3.bf16.msra.mxu0 %v972_v58 }
  0x27   :  { %1005 = vmatpush3.bf16.msra.mxu1 %v1004_v59  ;;  %975 = vmatprep.subr.bf16.mxu0 %v974_v60 }
  0x28   :  { %1007 = vmatprep.subr.bf16.mxu1 %v1006_v0 }
  0x2a   :  { %977 = vmatpush3.bf16.msra.mxu0 %v976_v6 }
  0x2b   :  { %1009 = vmatpush3.bf16.msra.mxu1 %v1008_v7  ;;  %979 = vmatprep.subr.bf16.mxu0 %v978_v8 }
  0x2c   :  { %1011 = vmatprep.subr.bf16.mxu1 %v1010_v12 }
  0x2d   :  { %10 = vsyncpa [#allocation3], 0  ;;  %v984_v32 = vpack.c.bf16 %v94_v23, %v93_v20  ;;  %v1453_v33 = vrot.slane %v22_v31, %v1292_v13  ;;  %v170_v34 = vcombine.high %v22_v31, %v22_v31  ;;  %v1016_v35 = vpack.c.bf16 %v126_v25, %v125_v24  ;;  %v95_v37 = vld [vmem:[%s1648_s1 + $0x240] sm:$0xff]  ;;  %v96_v38 = vld [vmem:[%s1648_s1 + $0x248] sm:$0xff] }
  0x2e   :  { %981 = vmatpush3.bf16.msra.mxu0 %v980_v19  ;;  %v986_v36 = vpack.c.bf16 %v112_v28, %v111_v27  ;;  %v127_v39 = vld [vmem:[%s1648_s1 + $0x340] sm:$0xff]  ;;  %v1018_v40 = vpack.c.bf16 %v144_v30, %v143_v29  ;;  %v128_v41 = vld [vmem:[%s1648_s1 + $0x348] sm:$0xff]  ;;  %v113_v42 = vld [vmem:[%s1648_s1 + $0x2d0] sm:$0xff]  ;;  %v988_v48 = vpack.c.bf16 %v96_v38, %v95_v37  ;;  %v1109_v37 = vmov 0.0|0.0  }
  0x2f   :  { %1013 = vmatpush3.bf16.msra.mxu1 %v1012_v21  ;;  %983 = vmatprep.subr.bf16.mxu0 %v982_v22  ;;  %v114_v43 = vld [vmem:[%s1648_s1 + $0x2d8] sm:$0xff]  ;;  %v185_v44 = vcombine.high %v1453_v33, %v1453_v33  ;;  %v184_v45 = vrot.slane %v170_v34, %v1292_v13  ;;  %v145_v46 = vld [vmem:[%s1648_s1 + $0x3d0] sm:$0xff]  ;;  %v1020_v50 = vpack.c.bf16 %v128_v41, %v127_v39  ;;  %v115_v56 = vld [vmem:[%s1648_s1 + $0x2e0] sm:$0xff]  ;;  %vm485_vm0 = vcmask 326656  }
  0x30   :  { %1015 = vmatprep.subr.bf16.mxu1 %v1014_v26  ;;  %v146_v47 = vld [vmem:[%s1648_s1 + $0x3d8] sm:$0xff]  ;;  %v990_v51 = vpack.c.bf16 %v114_v43, %v113_v42  ;;  %v97_v13 = vld [vmem:[%s1648_s1 + $0x250] sm:$0xff]  ;;  %v116_v57 = vld [vmem:[%s1648_s1 + $0x2e8] sm:$0xff]  ;;  %vm580_vm1 = vcmask 130048   ;;  %vm1110_vm2 = vmmov 0   ;;  %vm736_vm3 = vcmask 91136  }
  0x31   :  { %399 = vmatprep.mubr.f32.mxu0 %v185_v44  ;;  %v186_v49 = vcombine.high %v184_v45, %v184_v45  ;;  %v98_v52 = vld [vmem:[%s1648_s1 + $0x258] sm:$0xff]  ;;  %v129_v53 = vld [vmem:[%s1648_s1 + $0x350] sm:$0xff]  ;;  %v1022_v54 = vpack.c.bf16 %v146_v47, %v145_v46  ;;  %v147_v58 = vld [vmem:[%s1648_s1 + $0x3e0] sm:$0xff]  ;;  %v994_v62 = vpack.c.bf16 %v116_v57, %v115_v56 }
  0x32   :  { %985 = vmatpush3.bf16.msra.mxu0 %v984_v32  ;;  %v130_v55 = vld [vmem:[%s1648_s1 + $0x358] sm:$0xff]  ;;  %v148_v59 = vld [vmem:[%s1648_s1 + $0x3e8] sm:$0xff]  ;;  %v992_v60 = vpack.c.bf16 %v98_v52, %v97_v13  ;;  %v99_v63 = vld [vmem:[%s1648_s1 + $0x260] sm:$0xff] }
  0x33   :  { %1017 = vmatpush3.bf16.msra.mxu1 %v1016_v35  ;;  %987 = vmatprep.subr.bf16.mxu0 %v986_v36  ;;  %v1024_v61 = vpack.c.bf16 %v130_v55, %v129_v53  ;;  %v100_v0 = vld [vmem:[%s1648_s1 + $0x268] sm:$0xff]  ;;  %v131_v1 = vld [vmem:[%s1648_s1 + $0x360] sm:$0xff]  ;;  %v1026_v2 = vpack.c.bf16 %v148_v59, %v147_v58  ;;  %v117_v4 = vld [vmem:[%s1648_s1 + $0x2f0] sm:$0xff] }
  0x34   :  { %1019 = vmatprep.subr.bf16.mxu1 %v1018_v40  ;;  %469 = vmatprep.mubr.f32.mxu1 %v186_v49  ;;  %v132_v3 = vld [vmem:[%s1648_s1 + $0x368] sm:$0xff]  ;;  %v118_v5 = vld [vmem:[%s1648_s1 + $0x2f8] sm:$0xff]  ;;  %v149_v6 = vld [vmem:[%s1648_s1 + $0x3f0] sm:$0xff]  ;;  %v996_v8 = vpack.c.bf16 %v100_v0, %v99_v63 }
  0x35   :  { %v150_v7 = vld [vmem:[%s1648_s1 + $0x3f8] sm:$0xff]  ;;  %v1028_v9 = vpack.c.bf16 %v132_v3, %v131_v1  ;;  %v998_v10 = vpack.c.bf16 %v118_v5, %v117_v4  ;;  %v101_v11 = vld [vmem:[%s1648_s1 + $0x270] sm:$0xff]  ;;  %v476_v19 = vld [vmem:[%s1649_s2 + $0x8] sm:$0xff] }
  0x36   :  { %989 = vmatpush3.bf16.msra.mxu0 %v988_v48  ;;  %v102_v12 = vld [vmem:[%s1648_s1 + $0x278] sm:$0xff]  ;;  %v1030_v14 = vpack.c.bf16 %v150_v7, %v149_v6  ;;  %v133_v15 = vld [vmem:[%s1648_s1 + $0x370] sm:$0xff]  ;;  %v475_v21 = vld [vmem:[%s1649_s2] sm:$0xff] }
  0x37   :  { %1021 = vmatpush3.bf16.msra.mxu1 %v1020_v50  ;;  %991 = vmatprep.subr.bf16.mxu0 %v990_v51  ;;  %v134_v16 = vld [vmem:[%s1648_s1 + $0x378] sm:$0xff]  ;;  %v1000_v17 = vpack.c.bf16 %v102_v12, %v101_v11  ;;  %v477_v23 = vld [vmem:[%s1649_s2 + $0x10] sm:$0xff]  ;;  %v480_v25 = vld [vmem:[%s1649_s2 + $0x28] sm:$0xff] }
  0x38   :  { %1023 = vmatprep.subr.bf16.mxu1 %v1022_v54  ;;  %v1032_v18 = vpack.c.bf16 %v134_v16, %v133_v15  ;;  %v478_v20 = vld [vmem:[%s1649_s2 + $0x18] sm:$0xff]  ;;  %v1036_v24 = vpack.c.bf16 %v477_v23, %v475_v21  ;;  %v479_v28 = vld [vmem:[%s1649_s2 + $0x20] sm:$0xff]  ;;  %v481_v29 = vld [vmem:[%s1649_s2 + $0x30] sm:$0xff] }
  0x39   :  { %v1034_v22 = vpack.c.bf16 %v478_v20, %v476_v19  ;;  %v482_v26 = vld [vmem:[%s1649_s2 + $0x38] sm:$0xff]  ;;  %v1040_v30 = vpack.c.bf16 %v481_v29, %v479_v28  ;;  %v484_v31 = vld [vmem:[%s1649_s2 + $0x48] sm:$0xff]  ;;  %v483_v32 = vld [vmem:[%s1649_s2 + $0x40] sm:$0xff] }
  0x3a   :  { %993 = vmatpush3.bf16.msra.mxu0 %v992_v60  ;;  %v1038_v27 = vpack.c.bf16 %v482_v26, %v480_v25  ;;  %v562_v34 = vld [vmem:[%s1650_s3] sm:$0xff]  ;;  %v563_v35 = vld [vmem:[%s1650_s3 + $0x8] sm:$0xff]  ;;  %v564_v36 = vld [vmem:[%s1650_s3 + $0x10] sm:$0xff] }
  0x3b   :  { %1025 = vmatpush3.bf16.msra.mxu1 %v1024_v61  ;;  %995 = vmatprep.subr.bf16.mxu0 %v994_v62  ;;  %v1043_v38 = vpack.c.bf16 %v563_v35, %v562_v34  ;;  %v565_v39 = vld [vmem:[%s1650_s3 + $0x18] sm:$0xff]  ;;  %v566_v41 = vld [vmem:[%s1650_s3 + $0x20] sm:$0xff]  ;;  %v567_v42 = vld [vmem:[%s1650_s3 + $0x28] sm:$0xff] }
  0x3c   :  { %1027 = vmatprep.subr.bf16.mxu1 %v1026_v2  ;;  %v1046_v40 = vpack.c.bf16 %v565_v39, %v564_v36  ;;  %v1049_v43 = vpack.c.bf16 %v567_v42, %v566_v41  ;;  %v568_v44 = vld [vmem:[%s1650_s3 + $0x30] sm:$0xff]  ;;  %v570_v47 = vld [vmem:[%s1650_s3 + $0x40] sm:$0xff]  ;;  %v571_v48 = vld [vmem:[%s1650_s3 + $0x48] sm:$0xff] }
  0x3d   :  { %v1055_v49 = vpack.c.bf16 %v571_v48, %v570_v47  ;;  %v572_v50 = vld [vmem:[%s1650_s3 + $0x50] sm:$0xff]  ;;  %v573_v51 = vld [vmem:[%s1650_s3 + $0x58] sm:$0xff]  ;;  %v574_v52 = vld [vmem:[%s1650_s3 + $0x60] sm:$0xff] }
  0x3e   :  { %997 = vmatpush3.bf16.msra.mxu0 %v996_v8  ;;  %v1058_v13 = vpack.c.bf16 %v573_v51, %v572_v50  ;;  %v575_v53 = vld [vmem:[%s1650_s3 + $0x68] sm:$0xff]  ;;  %v576_v55 = vld [vmem:[%s1650_s3 + $0x70] sm:$0xff]  ;;  %v577_v56 = vld [vmem:[%s1650_s3 + $0x78] sm:$0xff] }
  0x3f   :  { %1029 = vmatpush3.bf16.msra.mxu1 %v1028_v9  ;;  %999 = vmatprep.subr.bf16.mxu0 %v998_v10  ;;  %v1061_v54 = vpack.c.bf16 %v575_v53, %v574_v52  ;;  %v1064_v57 = vpack.c.bf16 %v577_v56, %v576_v55  ;;  %v578_v9 = vld [vmem:[%s1650_s3 + $0x80] sm:$0xff]  ;;  %v579_v10 = vld [vmem:[%s1650_s3 + $0x88] sm:$0xff] }
  0x40   :  { %1031 = vmatprep.subr.bf16.mxu1 %v1030_v14  ;;  %v1067_v11 = vpack.c.bf16 %v579_v10, %v578_v9  ;;  %v655_v12 = vld [vmem:[%s1651_s4] sm:$0xff]  ;;  %v656_v14 = vld [vmem:[%s1651_s4 + $0x8] sm:$0xff] }
  0x41   :  { %v1070_v15 = vpack.c.bf16 %v656_v14, %v655_v12 }
  0x42   :  { %1001 = vmatpush3.bf16.msra.mxu0 %v1000_v17 }
  0x43   :  { %1033 = vmatpush3.bf16.msra.mxu1 %v1032_v18  ;;  %1035 = vmatprep.subr.bf16.mxu0 %v1034_v22 }
  0x44   :  { %1042 = vmatprep.subr.bf16.mxu1 %v1109_v37 }
  0x45   :  { %400 = vmatmul.mubr.f32.vlgmr.msra.gmra.mrb[2].mxu0 %v1453_v33  ;;  %v1108_v33 = vmov 0.0  }
  0x46   :  { %470 = vmatmul.mubr.f32.vlgmr.msra.gmra.mrb[2].mxu1 %v184_v45  ;;  %1037 = vmatpush1.bf16.msra.mxu0 %v1036_v24  ;;  %v569_v45 = vld [vmem:[%s1650_s3 + $0x38] sm:$0xff]  ;;  %s1111_s3 = smov [#allocation2]  }
  0x47   :  { %1039 = vmatprep.subr.bf16.mxu0 %v1038_v27  ;;  %553 = vmatprep.mubr.f32.mxu0 %v1108_v33  ;;  %v1052_v46 = vpack.c.bf16 %v569_v45, %v568_v44  ;;  %s744_s4 = sshll.u32 %s1111_s3, 4  ;;  %s745_s4 = int_to_ptr.vmem [resolvable:$true] %s744_s4 }
  0x48   :  { %1044 = vmatpush1.bf16.msra.mxu1 %v1043_v38  ;;  %s1083_s1 = scalar_lea.vmem %s745_s4, 32  ;;  %p1088_p1 = scmp.lt.s32.totalorder %s745_s4, %s745_s4 }
  0x49   :  { %1045 = vmatprep.subr.bf16.mxu1 %v1109_v37  ;;  %p1084_p0 = scmp.ne.s32.totalorder %s745_s4, %s1083_s1  ;;  %p1089_p2 = scmp.lt.s32.totalorder %s1083_s1, %s1083_s1 }
  0x4a   :  { %1041 = vmatpush1.bf16.msra.mxu0 %v1040_v30 }
  0x4b   :  { %497 = vmatprep.subr.mxu0 %v484_v31  ;;  %p1090_p3 = por %p1089_p2, %p1088_p1 }
  0x4c   :  { %1047 = vmatpush1.bf16.msra.mxu1 %v1046_v40 }
  0x4d   :  { %1048 = vmatprep.subr.bf16.mxu1 %v1109_v37  ;;  %p1091_p4 = pnand %p1090_p3, %p1084_p0 }
  0x4e   :  { %498 = vmatpush1.msra.mxu0 %v483_v32 }
  0x4f   :  { %1069 = vmatprep.subr.bf16.mxu0 %v1109_v37 }
  0x50   :  { %1050 = vmatpush1.bf16.msra.mxu1 %v1049_v43 }
  0x51   :  { %1051 = vmatprep.subr.bf16.mxu1 %v1109_v37 }
  0x54   :  { %1053 = vmatpush1.bf16.msra.mxu1 %v1052_v46 }
  0x55   :  { %1054 = vmatprep.subr.bf16.mxu1 %v1109_v37 }
  0x58   :  { %1056 = vmatpush1.bf16.msra.mxu1 %v1055_v49 }
  0x59   :  { %1057 = vmatprep.subr.bf16.mxu1 %v1109_v37 }
  0x5c   :  { %1059 = vmatpush1.bf16.msra.mxu1 %v1058_v13 }
  0x5d   :  { %1060 = vmatprep.subr.bf16.mxu1 %v1109_v37 }
  0x60   :  { %1062 = vmatpush1.bf16.msra.mxu1 %v1061_v54 }
  0x61   :  { %1063 = vmatprep.subr.bf16.mxu1 %v1109_v37 }
  0x64   :  { %1065 = vmatpush1.bf16.msra.mxu1 %v1064_v57 }
  0x65   :  { %1066 = vmatprep.subr.bf16.mxu1 %v1109_v37 }
  0x68   :  { %1068 = vmatpush1.bf16.msra.mxu1 %v1067_v11 }
  0xf8   :  { %v788_v58 = vpop.f32.mrb[0].mxu0 }
  0xf9   :  { %v823_v59 = vpop.f32.mrb[0].mxu1  ;;  %v789_v60 = vpop.f32.mrb[1].mxu0 }
  0xfa   :  { %v790_v61 = vadd.f32 %v789_v60, %v788_v58  ;;  %v824_v62 = vpop.f32.mrb[1].mxu1 }
  0xfb   :  { %v825_v63 = vadd.f32 %v824_v62, %v823_v59 }
  0xfd   :  { %v332_v0 = vadd.f32 %v825_v63, %v790_v61 }
 0x118   :  { %v858_v1 = vpop.f32.mrb[2].mxu0 }
 0x119   :  { %v859_v2 = vpop.f32.mrb[3].mxu0  ;;  %v893_v3 = vpop.f32.mrb[2].mxu1 }
 0x11a   :  { %v860_v4 = vadd.f32 %v859_v2, %v858_v1  ;;  %v894_v5 = vpop.f32.mrb[3].mxu1 }
 0x11b   :  { %v895_v6 = vadd.f32 %v894_v5, %v893_v3 }
 0x11c   :  { %v402_v7 = vadd.f32 %v860_v4, %v332_v0 }
 0x11e   :  { %v472_v8 = vadd.f32 %v895_v6, %v402_v7 }
 0x120   :  { %752 = vmatmul.mubr.msk.f32.vlgmr.msra.gmra.mrb[4].mxu0 %vm485_vm0, %v472_v8 }
 0x121   :  { %1071 = vmatpush3.bf16.msra.mxu0 %v1070_v15  ;;  %903 = vmatprep.mubr.msk.f32.mxu0 %vm1110_vm2, %v1108_v33 }
 0x1f3   :  { %v555_v16 = vpop.f32.mrb[4].mxu0 }
 0x1f4   :  { %v557_v17 = vpop.f32.mrb[5].mxu0  ;;  %v560_v19 = vmax.f32 %v555_v16, 0.0 }
 0x1f5   :  { %v561_v18 = vmax.f32 %v557_v17, 0.0 }
 0x1f7   :  { %753 = vmatprep.mubr.msk.f32.mxu1 %vm580_vm1, %v561_v18 }
 0x1f8   :  { %649 = vmatmul.mubr.f32.vlgmr.msra.gmra.mrb[4].mxu1 %v560_v19 }
 0x2cb   :  { %v650_v20 = vpop.f32.mrb[4].mxu1 }
 0x2cc   :  { %v654_v21 = vmax.f32 %v650_v20, 0.0  ;;  %v652_v22 = vpop.f32.mrb[5].mxu1 }
 0x2ce   :  { %904 = vmatmul.mubr.msk.f32.vlgmr.msra.gmra.mrb[6].mxu0 %vm580_vm1, %v654_v21 }
 0x3a1   :  { %v726_v23 = vpop.f32.mrb[6].mxu0 }
 0x3a2   :  { %v755_v24 = vmul.f32 -1.442695, %v726_v23  ;;  %v905_v25 = vpop.f32.mrb[7].mxu0 }
 0x3a4   :  { %1079 = vpow2.f32 %v755_v24 }
 0x3ae   :  { %v1080_v26 = vpop.eup %1079 }
 0x3af   :  { %v733_v27 = vadd.f32 1.0, %v1080_v26 }
 0x3b1   :  { %1081 = vrcp.f32 %v733_v27 }
 0x3bb   :  { %v1082_v28 = vpop.eup %1081 }
 0x3bc   :  { %737 = vst.msk [vmem:[#allocation2] sm:$0x3] %vm736_vm3, %v1082_v28 }
 0x3bd   :  { %1094 = shalt.err (!%p1091_p4)
}
 0x3be   :  { %s1095_s6 = scalar_lea.hbm %s1652_s5, 32 }
 0x3bf   :  { %p1096_p5 = scmp.ne.s32.totalorder %s1652_s5, %s1095_s6  ;;  %p1099_p6 = scmp.lt.u32.totalorder %s1095_s6, %s1652_s5 }
 0x3c1   :  { %p1101_p7 = pnand %p1099_p6, %p1096_p5 }
 0x3c3   :  { %1104 = shalt.err (!%p1101_p7)
}
 0x3c4   :  { %747 = dma.vmem_to_hbm [thread:$0]  %s745_s4, 32, %s1652_s5, [#allocation3]  }
 0x3c5   :  { %1105 = dma.done.wait [#allocation3], 32  }
 0x3c6   :  { %1106 = vsyncadd [#allocation3], 4294967264 }
 0x3c7   :  { %751 = vsyncpa [#allocation3], 1 }

</bundles_post_ra>
